<compile_context>
chip_gen: v5e
topology: v5e:2x2
jax: 0.10.0
libtpu: 0.0.40
codegen_flags: <defaults>
</compile_context>

<pallas_src>
import functools

import numpy as np
import jax
import jax.numpy as jnp
from jax.experimental import pallas as pl
from jax.experimental.pallas import tpu as pltpu


_VMEM_LIMIT_BYTES = 32 * 1024 * 1024     # explicit scoped-VMEM request (safe on v5e/v6e/v7x)
_W_RESIDENT_BUDGET = 8 * 1024 * 1024     # keep pooling matrix fully resident if <= this
_REDUCE_BLOCK_BUDGET = 8 * 1024 * 1024   # budget for the double-buffered x block (reduce path)


def _round_up(x: int, m: int) -> int:
    return ((x + m - 1) // m) * m


# ---------------------------------------------------------------------------
# Path 1: L % D == 0  ->  segment mean (pure VPU/XLU reduction, no pooling matrix)
# ---------------------------------------------------------------------------
def _segment_mean_kernel(x_ref, o_ref, *, seg: int):
    # x_ref: (TM, D, seg)  ->  o_ref: (TM, D)
    x = x_ref[...].astype(jnp.float32)
    o_ref[...] = jnp.sum(x, axis=-1) * (1.0 / float(seg))


@functools.partial(jax.jit, static_argnames=("d", "seg", "tm", "compute_dtype"))
def _mean_mapper_reduce(x_flat, *, d, seg, tm, compute_dtype):
    b = x_flat.shape[0]
    b_pad = _round_up(b, tm)
    x3 = x_flat.reshape(b, d, seg).astype(compute_dtype)   # row-major: free reshape
    if b_pad != b:
        x3 = jnp.pad(x3, ((0, b_pad - b), (0, 0), (0, 0)))

    out = pl.pallas_call(
        functools.partial(_segment_mean_kernel, seg=seg),
        out_shape=jax.ShapeDtypeStruct((b_pad, d), jnp.float32),
        grid_spec=pltpu.PrefetchScalarGridSpec(
            num_scalar_prefetch=0,
            grid=(b_pad // tm,),
            in_specs=[pl.BlockSpec((tm, d, seg), lambda i: (i, 0, 0))],
            out_specs=pl.BlockSpec((tm, d), lambda i: (i, 0)),
        ),
        compiler_params=pltpu.CompilerParams(
            dimension_semantics=("parallel",),          # batch tiles are independent
            vmem_limit_bytes=_VMEM_LIMIT_BYTES,
        ),
    )(x3)
    return out[:b]


# ---------------------------------------------------------------------------
# Path 2: general ragged-bin case -> tiled (B, L) @ (L, D) matmul on the MXU
# ---------------------------------------------------------------------------
def _pool_matmul_kernel(x_ref, w_ref, o_ref, *, tk: int, w_resident: bool):
    k = pl.program_id(1)

    @pl.when(k == 0)
    def _():
        o_ref[...] = jnp.zeros_like(o_ref)   # output block is resident across k

    if w_resident:
        # Full pooling matrix lives in VMEM (fetched once); slice the K chunk.
        start = pl.multiple_of(k * tk, tk)
        w = w_ref[pl.ds(start, tk), :]
    else:
        w = w_ref[...]                        # streamed (tk, D_pad) tile

    o_ref[...] += jnp.dot(x_ref[...], w, preferred_element_type=jnp.float32)


@functools.partial(
    jax.jit,
    static_argnames=("d", "d_pad", "l_pad", "tm", "tk", "w_resident", "compute_dtype"),
)
def _mean_mapper_matmul(x_flat, w, *, d, d_pad, l_pad, tm, tk, w_resident, compute_dtype):
    b, l = x_flat.shape
    b_pad = _round_up(b, tm)
    x = x_flat.astype(compute_dtype)
    if (b_pad != b) or (l_pad != l):
        x = jnp.pad(x, ((0, b_pad - b), (0, l_pad - l)))   # zero pad (exact: W pad rows are 0)

    num_b = b_pad // tm
    num_k = l_pad // tk

    if w_resident:
        w_spec = pl.BlockSpec((l_pad, d_pad), lambda i, k: (0, 0))   # constant index -> DMA'd once
    else:
        w_spec = pl.BlockSpec((tk, d_pad), lambda i, k: (k, 0))

    out = pl.pallas_call(
        functools.partial(_pool_matmul_kernel, tk=tk, w_resident=w_resident),
        out_shape=jax.ShapeDtypeStruct((b_pad, d_pad), jnp.float32),
        grid_spec=pltpu.PrefetchScalarGridSpec(
            num_scalar_prefetch=0,
            grid=(num_b, num_k),                       # reduction axis last
            in_specs=[
                pl.BlockSpec((tm, tk), lambda i, k: (i, k)),
                w_spec,
            ],
            out_specs=pl.BlockSpec((tm, d_pad), lambda i, k: (i, 0)),   # resident accumulator
        ),
        compiler_params=pltpu.CompilerParams(
            dimension_semantics=("parallel", "arbitrary"),   # B tiles parallel (megacore)
            vmem_limit_bytes=_VMEM_LIMIT_BYTES,
        ),
    )(x, w)
    return out[:b, :d]


@functools.lru_cache(maxsize=None)
def _pooling_matrix_np(length: int, length_pad: int, out_dim: int, out_dim_pad: int) -> np.ndarray:
    """Exact adaptive_avg_pool1d as an (L_pad, D_pad) matrix (PyTorch bin convention).

    Rows >= `length` are zero (they line up with the zero-padded x columns) and
    columns >= `out_dim` are zero (lane padding of the output; sliced off afterwards).
    Built once per shape tuple and passed to the kernel as a regular operand.
    """
    w = np.zeros((length_pad, out_dim_pad), dtype=np.float32)
    for i in range(out_dim):
        start = (i * length) // out_dim                 # floor(i*L/D)
        end = -((-(i + 1) * length) // out_dim)         # ceil((i+1)*L/D)
        w[start:end, i] = 1.0 / float(end - start)
    return w


def mean_mapper(features, preprocessing_dim, compute_dtype=jnp.float32):
    """JAX/Pallas equivalent of MeanMapper.forward.

    features: any shape with leading batch dim B (e.g. NCHW conv features).
    returns:  (B, preprocessing_dim) float32.
    compute_dtype: dtype fed to the kernel. jnp.bfloat16 halves HBM traffic and
      doubles MXU throughput; accumulation is always float32.
    """
    b = int(features.shape[0])
    d = int(preprocessing_dim)
    x_flat = features.reshape(b, -1)
    l = int(x_flat.shape[1])
    x_bytes = int(jnp.dtype(compute_dtype).itemsize)

    b8 = _round_up(b, 8)

    # ---- Path 1: uniform bins -> pure reduction (reads x exactly once).
    if l % d == 0:
        seg = l // d
        lane_seg = _round_up(seg, 128)                  # minor dim is lane-padded in VMEM
        row_bytes = d * lane_seg * x_bytes              # one batch row of the (TM, D, seg) block
        tm_red = (_REDUCE_BLOCK_BUDGET // max(2 * row_bytes, 1)) // 8 * 8
        tm_red = min(tm_red, 512, b8)
        # Use it only when a block fits and lane padding is not catastrophic.
        if tm_red >= 8 and seg >= 32:
            return _mean_mapper_reduce(
                x_flat, d=d, seg=int(seg), tm=int(tm_red), compute_dtype=compute_dtype)

    # ---- Path 2: ragged bins -> MXU matmul against the pooling matrix.
    # Batch (M) tile: large to amortize pooling-matrix re-streaming across batch tiles,
    # but never pad a small batch past itself.
    tm = b8 if b8 <= 512 else 512

    d_pad = _round_up(d, 128)                           # lane-dense output, full MXU N

    base_tk = 2048 if x_bytes <= 2 else 1024
    # Cap tk so a double-buffered streamed (tk, D_pad) W tile stays within budget.
    tk_cap = max(128, ((_W_RESIDENT_BUDGET // 2) // max(d_pad * x_bytes, 1)) // 128 * 128)
    base_tk = max(128, min(base_tk, tk_cap))

    # Choose the K tile (multiple of 128) that minimizes L padding, prefer larger tiles.
    l128 = _round_up(l, 128)
    tk, l_pad = 128, l128
    for c in range(128, base_tk + 1, 128):
        p = _round_up(l128, c)
        if (p < l_pad) or (p == l_pad and c > tk):
            tk, l_pad = c, p

    w_resident = (l_pad * d_pad * x_bytes) <= _W_RESIDENT_BUDGET
    w = jnp.asarray(_pooling_matrix_np(l, l_pad, d, d_pad), dtype=compute_dtype)

    return _mean_mapper_matmul(
        x_flat, w, d=d, d_pad=int(d_pad), l_pad=int(l_pad), tm=int(tm), tk=int(tk),
        w_resident=bool(w_resident), compute_dtype=compute_dtype)


# ---------------------------------------------------------------------------
# Pure-numpy reference (mirrors F.adaptive_avg_pool1d) for verification.
# ---------------------------------------------------------------------------
def _reference(features: np.ndarray, d: int) -> np.ndarray:
    b = features.shape[0]
    x = features.reshape(b, -1).astype(np.float32)
    length = x.shape[1]
    out = np.zeros((b, d), dtype=np.float32)
    for i in range(d):
        start = (i * length) // d
        end = -((-(i + 1) * length) // d)
        out[:, i] = x[:, start:end].mean(axis=1)
    return out


if __name__ == "__main__":
    key = jax.random.PRNGKey(0)
    # Small NCHW input consistent with how MeanMapper is used on conv features.
    x = jax.random.normal(key, (2, 4, 16, 16), dtype=jnp.float32)   # B=2, L=1024
    x_np = np.asarray(x)

    # Path 1: L % D == 0 -> segment-mean reduction kernel (exact, f32).
    d1 = 32
    y1 = jax.block_until_ready(mean_mapper(x, d1))
    np.testing.assert_allclose(np.asarray(y1), _reference(x_np, d1), rtol=1e-5, atol=1e-5)

    # Path 2: ragged bins (L % D != 0) -> tiled MXU matmul kernel (exact, f32).
    d2 = 24
    y2 = jax.block_until_ready(mean_mapper(x, d2))
    np.testing.assert_allclose(np.asarray(y2), _reference(x_np, d2), rtol=1e-5, atol=1e-5)

    # Path 3: bf16-fed MXU with f32 accumulation (perf option) -> loose tolerance.
    y3 = jax.block_until_ready(mean_mapper(x, d2, compute_dtype=jnp.bfloat16))
    np.testing.assert_allclose(np.asarray(y3), _reference(x_np, d2), rtol=2e-2, atol=3e-2)

    print("KERNEL_OK")
</pallas_src>

<mosaic_0001>
module attributes {stable_mosaic.version = 11 : i64} {
  func.func @_segment_mean_kernel(%arg0: i32, %arg1: memref<8x32x32xf32, #tpu.memory_space<vmem>>, %arg2: memref<8x32xf32, #tpu.memory_space<vmem>>) attributes {dimension_semantics = [#tpu.dimension_semantics<parallel>], iteration_bounds = array<i64: 1>, scalar_prefetch = 0 : i64, scratch_operands = 0 : i64, tpu.core_type = #tpu.core_type<tc>, window_params = [{transform_indices = @transform_0, window_bounds = array<i64: 8, 32, 32>}, {transform_indices = @transform_1, window_bounds = array<i64: 8, 32>}]} {
    %c0 = arith.constant 0 : index
    %c0_0 = arith.constant 0 : index
    %c0_1 = arith.constant 0 : index
    %0 = vector.load %arg1[%c0, %c0_0, %c0_1] : memref<8x32x32xf32, #tpu.memory_space<vmem>>, vector<8x32x32xf32>
    %cst = arith.constant dense<0.000000e+00> : vector<8x32xf32>
    %1 = vector.multi_reduction <add>, %0, %cst [2] : vector<8x32x32xf32> to vector<8x32xf32>
    %cst_2 = arith.constant 3.125000e-02 : f32
    %2 = vector.broadcast %cst_2 : f32 to vector<8x32xf32>
    %3 = arith.mulf %1, %2 : vector<8x32xf32>
    %c0_3 = arith.constant 0 : index
    %c0_4 = arith.constant 0 : index
    %4 = vector.load %arg2[%c0_3, %c0_4] : memref<8x32xf32, #tpu.memory_space<vmem>>, vector<8x32xf32>
    tpu.vector_store %arg2[%c0_3, %c0_4], %3 {strides = array<i32>} : memref<8x32xf32, #tpu.memory_space<vmem>>, vector<8x32xf32>,
    return
  }
  func.func @transform_0(%arg0: i32) -> (i32, i32, i32) {
    %c0_i32 = arith.constant 0 : i32
    %c0_i32_0 = arith.constant 0 : i32
    %c0_i32_1 = arith.constant 0 : i32
    return %arg0, %c0_i32, %c0_i32_0 : i32, i32, i32
  }
  func.func @transform_1(%arg0: i32) -> (i32, i32) {
    %c0_i32 = arith.constant 0 : i32
    %c0_i32_0 = arith.constant 0 : i32
    return %arg0, %c0_i32 : i32, i32
  }
}

</mosaic_0001>

<bundles_post_ra>
// kernel: _mean_mapper_reduce.1
= control target key start
LH: loop header
LB: loop body
LE: loop exit
PB: predicated region body
PF: predicated region fallthrough
CT: control target
= control target key end

     0   :  { %vm40_vm0 = vcmask 261120   ;;  %vm206_vm1 = vcmask 130112   ;;  %vm210_vm2 = vcmask 195712   ;;  %vm214_vm3 = vcmask 261312   ;;  %s500_s0 = inlined_call_operand.vmem [shape: f32[8,32,32], index: 0, kind: input, shape index: {}]   ;;  %s501_s1 = inlined_call_operand.vmem [shape: f32[8,32], index: 1, kind: output, shape index: {}]  }
   0x1   :  { %v12_v0 = vld [vmem:[%s500_s0 + $0x20] sm:$0xff]  ;;  %v10_v1 = vld [vmem:[%s500_s0 + $0x10] sm:$0xff]  ;;  %v13_v6 = vld [vmem:[%s500_s0 + $0x28] sm:$0xff]  ;;  %vm265_vm4 = vcmask 1041409   ;;  %vm267_vm5 = vcmask 1042434   ;;  %vm269_vm6 = vcmask 1043459  }
   0x2   :  { %v8_v2 = vld [vmem:[%s500_s0] sm:$0xff]  ;;  %v53_v3 = vsel %vm40_vm0, %v12_v0, 0.0  ;;  %v47_v4 = vsel %vm40_vm0, %v10_v1, 0.0  ;;  %v11_v7 = vld [vmem:[%s500_s0 + $0x18] sm:$0xff]  ;;  %v9_v8 = vld [vmem:[%s500_s0 + $0x8] sm:$0xff]  ;;  %v56_v9 = vsel %vm40_vm0, %v13_v6, 0.0 }
   0x3   :  { %v41_v5 = vsel %vm40_vm0, %v8_v2, 0.0  ;;  %54 = vadd.xlane.f32.xlu2 %v53_v3  ;;  %48 = vadd.xlane.f32.xlu1 %v47_v4  ;;  %v50_v10 = vsel %vm40_vm0, %v11_v7, 0.0  ;;  %v44_v11 = vsel %vm40_vm0, %v9_v8, 0.0  ;;  %v16_v12 = vld [vmem:[%s500_s0 + $0x40] sm:$0xff]  ;;  %v15_v13 = vld [vmem:[%s500_s0 + $0x38] sm:$0xff]  ;;  %v14_v14 = vld [vmem:[%s500_s0 + $0x30] sm:$0xff]  ;;  %v201_v2 = vlaneseq }
   0x4   :  { %42 = vadd.xlane.f32.xlu0 %v41_v5  ;;  %v65_v15 = vsel %vm40_vm0, %v16_v12, 0.0  ;;  %v62_v16 = vsel %vm40_vm0, %v15_v13, 0.0  ;;  %v59_v17 = vsel %vm40_vm0, %v14_v14, 0.0  ;;  %v19_v18 = vld [vmem:[%s500_s0 + $0x58] sm:$0xff]  ;;  %v18_v19 = vld [vmem:[%s500_s0 + $0x50] sm:$0xff]  ;;  %v17_v20 = vld [vmem:[%s500_s0 + $0x48] sm:$0xff] }
   0x5   :  { %v74_v21 = vsel %vm40_vm0, %v19_v18, 0.0  ;;  %v71_v22 = vsel %vm40_vm0, %v18_v19, 0.0  ;;  %v68_v23 = vsel %vm40_vm0, %v17_v20, 0.0  ;;  %v22_v24 = vld [vmem:[%s500_s0 + $0x70] sm:$0xff]  ;;  %v21_v25 = vld [vmem:[%s500_s0 + $0x68] sm:$0xff]  ;;  %v20_v26 = vld [vmem:[%s500_s0 + $0x60] sm:$0xff] }
   0x6   :  { %v83_v27 = vsel %vm40_vm0, %v22_v24, 0.0  ;;  %v80_v28 = vsel %vm40_vm0, %v21_v25, 0.0  ;;  %v77_v29 = vsel %vm40_vm0, %v20_v26, 0.0  ;;  %v23_v30 = vld [vmem:[%s500_s0 + $0x78] sm:$0xff]  ;;  %v25_v31 = vld [vmem:[%s500_s0 + $0x88] sm:$0xff]  ;;  %v24_v32 = vld [vmem:[%s500_s0 + $0x80] sm:$0xff] }
   0x7   :  { %v86_v33 = vsel %vm40_vm0, %v23_v30, 0.0  ;;  %v92_v34 = vsel %vm40_vm0, %v25_v31, 0.0  ;;  %v89_v35 = vsel %vm40_vm0, %v24_v32, 0.0  ;;  %v29_v36 = vld [vmem:[%s500_s0 + $0xa8] sm:$0xff]  ;;  %v28_v37 = vld [vmem:[%s500_s0 + $0xa0] sm:$0xff]  ;;  %v26_v38 = vld [vmem:[%s500_s0 + $0x90] sm:$0xff] }
   0x8   :  { %v104_v39 = vsel %vm40_vm0, %v29_v36, 0.0  ;;  %v101_v40 = vsel %vm40_vm0, %v28_v37, 0.0  ;;  %v95_v41 = vsel %vm40_vm0, %v26_v38, 0.0  ;;  %v32_v42 = vld [vmem:[%s500_s0 + $0xc0] sm:$0xff]  ;;  %v30_v43 = vld [vmem:[%s500_s0 + $0xb0] sm:$0xff]  ;;  %v27_v44 = vld [vmem:[%s500_s0 + $0x98] sm:$0xff] }
   0x9   :  { %v113_v45 = vsel %vm40_vm0, %v32_v42, 0.0  ;;  %v107_v46 = vsel %vm40_vm0, %v30_v43, 0.0  ;;  %v98_v47 = vsel %vm40_vm0, %v27_v44, 0.0  ;;  %v34_v48 = vld [vmem:[%s500_s0 + $0xd0] sm:$0xff]  ;;  %v31_v49 = vld [vmem:[%s500_s0 + $0xb8] sm:$0xff]  ;;  %v33_v50 = vld [vmem:[%s500_s0 + $0xc8] sm:$0xff] }
   0xa   :  { %v119_v51 = vsel %vm40_vm0, %v34_v48, 0.0  ;;  %v110_v52 = vsel %vm40_vm0, %v31_v49, 0.0  ;;  %v116_v53 = vsel %vm40_vm0, %v33_v50, 0.0  ;;  %v35_v54 = vld [vmem:[%s500_s0 + $0xd8] sm:$0xff]  ;;  %v37_v55 = vld [vmem:[%s500_s0 + $0xe8] sm:$0xff]  ;;  %v36_v56 = vld [vmem:[%s500_s0 + $0xe0] sm:$0xff] }
   0xb   :  { %57 = vadd.xlane.f32.xlu2 %v56_v9  ;;  %51 = vadd.xlane.f32.xlu1 %v50_v10  ;;  %v122_v57 = vsel %vm40_vm0, %v35_v54, 0.0  ;;  %v128_v58 = vsel %vm40_vm0, %v37_v55, 0.0  ;;  %v125_v59 = vsel %vm40_vm0, %v36_v56, 0.0  ;;  %v39_v60 = vld [vmem:[%s500_s0 + $0xf8] sm:$0xff]  ;;  %v38_v61 = vld [vmem:[%s500_s0 + $0xf0] sm:$0xff]  ;;  %v423_v4 = vand.u32 127, %v201_v2 }
   0xc   :  { %45 = vadd.xlane.f32.xlu0 %v44_v11  ;;  %v134_v62 = vsel %vm40_vm0, %v39_v60, 0.0  ;;  %v131_v63 = vsel %vm40_vm0, %v38_v61, 0.0  ;;  %vm271_vm7 = vcmask 1044484   ;;  %vm273_vm8 = vcmask 1045509  }
   0xd   :  { %v426_v6 = vadd.s32 4294967288, %v423_v4  ;;  %v429_v8 = vadd.s32 4294967272, %v423_v4  ;;  %v432_v10 = vadd.s32 4294967280, %v423_v4  ;;  %vm275_vm9 = vcmask 1046534  }
   0xe   :  { %vm277_vm10 = vcmask 1047559  }
  0x13   :  { %66 = vadd.xlane.f32.xlu2 %v65_v15  ;;  %63 = vadd.xlane.f32.xlu1 %v62_v16 }
  0x14   :  { %60 = vadd.xlane.f32.xlu0 %v59_v17 }
  0x1b   :  { %75 = vadd.xlane.f32.xlu2 %v74_v21  ;;  %72 = vadd.xlane.f32.xlu1 %v71_v22 }
  0x1c   :  { %69 = vadd.xlane.f32.xlu0 %v68_v23 }
  0x23   :  { %84 = vadd.xlane.f32.xlu2 %v83_v27  ;;  %81 = vadd.xlane.f32.xlu1 %v80_v28 }
  0x24   :  { %78 = vadd.xlane.f32.xlu0 %v77_v29 }
  0x2b   :  { %87 = vadd.xlane.f32.xlu2 %v86_v33  ;;  %93 = vadd.xlane.f32.xlu1 %v92_v34 }
  0x2c   :  { %90 = vadd.xlane.f32.xlu0 %v89_v35 }
  0x33   :  { %105 = vadd.xlane.f32.xlu2 %v104_v39  ;;  %102 = vadd.xlane.f32.xlu1 %v101_v40 }
  0x34   :  { %96 = vadd.xlane.f32.xlu0 %v95_v41 }
  0x3b   :  { %114 = vadd.xlane.f32.xlu2 %v113_v45  ;;  %108 = vadd.xlane.f32.xlu1 %v107_v46 }
  0x3c   :  { %99 = vadd.xlane.f32.xlu0 %v98_v47 }
  0x43   :  { %120 = vadd.xlane.f32.xlu2 %v119_v51  ;;  %111 = vadd.xlane.f32.xlu1 %v110_v52 }
  0x44   :  { %117 = vadd.xlane.f32.xlu0 %v116_v53 }
  0x4b   :  { %123 = vadd.xlane.f32.xlu2 %v122_v57  ;;  %129 = vadd.xlane.f32.xlu1 %v128_v58 }
  0x4c   :  { %126 = vadd.xlane.f32.xlu0 %v125_v59 }
  0x53   :  { %135 = vadd.xlane.f32.xlu1 %v134_v62 }
  0x54   :  { %132 = vadd.xlane.f32.xlu0 %v131_v63 }
  0x76   :  { %v55_v0 = vpop.xlane.xlu2 %54  ;;  %v49_v1 = vpop.xlane.xlu1 %48 }
  0x77   :  { %v43_v3 = vpop.xlane.xlu0 %42  ;;  %v139_v11 = vmul.f32 0.03125, %v49_v1  ;;  %v141_v18 = vmul.f32 0.03125, %v55_v0 }
  0x78   :  { %v137_v5 = vmul.f32 0.03125, %v43_v3 }
  0x79   :  { %v209_v19 = vperm.slane %v139_v11, %v432_v10  ;;  %v216_v26 = vperm.slane %v141_v18, %v423_v4 }
  0x7a   :  { %v203_v15 = vperm.slane %v137_v5, %v423_v4 }
  0x7e   :  { %v58_v7 = vpop.xlane.xlu2 %57  ;;  %v52_v9 = vpop.xlane.xlu1 %51 }
  0x7f   :  { %v140_v12 = vmul.f32 0.03125, %v52_v9  ;;  %v46_v13 = vpop.xlane.xlu0 %45  ;;  %v142_v20 = vmul.f32 0.03125, %v58_v7 }
  0x80   :  { %v138_v14 = vmul.f32 0.03125, %v46_v13 }
  0x81   :  { %v213_v16 = vperm.slane %v140_v12, %v429_v8  ;;  %v217_v27 = vperm.slane %v142_v20, %v426_v6 }
  0x82   :  { %v205_v17 = vperm.slane %v138_v14, %v426_v6 }
  0x83   :  { %v218_v33 = vsel %vm206_vm1, %v217_v27, %v216_v26 }
  0x84   :  { %v207_v21 = vsel %vm206_vm1, %v205_v17, %v203_v15 }
  0x85   :  { %v211_v22 = vsel %vm210_vm2, %v209_v19, %v207_v21 }
  0x86   :  { %v215_v23 = vsel %vm214_vm3, %v213_v16, %v211_v22  ;;  %v67_v24 = vpop.xlane.xlu2 %66  ;;  %v64_v25 = vpop.xlane.xlu1 %63 }
  0x87   :  { %v144_v28 = vmul.f32 0.03125, %v64_v25  ;;  %v61_v29 = vpop.xlane.xlu0 %60  ;;  %v145_v52 = vmul.f32 0.03125, %v67_v24 }
  0x88   :  { %v143_v30 = vmul.f32 0.03125, %v61_v29 }
  0x89   :  { %v221_v31 = vperm.slane %v144_v28, %v429_v8  ;;  %v223_v60 = vperm.slane %v145_v52, %v423_v4 }
  0x8a   :  { %v219_v32 = vperm.slane %v143_v30, %v432_v10 }
  0x8c   :  { %v220_v34 = vsel %vm210_vm2, %v219_v32, %v218_v33 }
  0x8d   :  { %v222_v35 = vsel %vm214_vm3, %v221_v31, %v220_v34 }
  0x8e   :  { %v448_v36 = vsel %vm265_vm4, %v222_v35, %v215_v23  ;;  %v76_v37 = vpop.xlane.xlu2 %75  ;;  %v73_v38 = vpop.xlane.xlu1 %72 }
  0x8f   :  { %v70_v39 = vpop.xlane.xlu0 %69  ;;  %v147_v56 = vmul.f32 0.03125, %v73_v38  ;;  %v148_v62 = vmul.f32 0.03125, %v76_v37 }
  0x90   :  { %v146_v53 = vmul.f32 0.03125, %v70_v39 }
  0x91   :  { %v226_v63 = vperm.slane %v147_v56, %v432_v10  ;;  %v228_v12 = vperm.slane %v148_v62, %v429_v8 }
  0x92   :  { %v224_v61 = vperm.slane %v146_v53, %v426_v6 }
  0x94   :  { %v225_v3 = vsel %vm206_vm1, %v224_v61, %v223_v60 }
  0x95   :  { %v227_v17 = vsel %vm210_vm2, %v226_v63, %v225_v3 }
  0x96   :  { %v85_v40 = vpop.xlane.xlu2 %84  ;;  %v82_v41 = vpop.xlane.xlu1 %81 }
  0x97   :  { %v79_v42 = vpop.xlane.xlu0 %78  ;;  %v150_v57 = vmul.f32 0.03125, %v82_v41  ;;  %v151_v0 = vmul.f32 0.03125, %v85_v40 }
  0x98   :  { %v149_v58 = vmul.f32 0.03125, %v79_v42  ;;  %v229_v42 = vsel %vm214_vm3, %v228_v12, %v227_v17 }
  0x99   :  { %v231_v1 = vperm.slane %v150_v57, %v426_v6  ;;  %v233_v18 = vperm.slane %v151_v0, %v432_v10  ;;  %v268_v56 = vsel %vm267_vm5, %v229_v42, %v448_v36 }
  0x9a   :  { %v230_v2 = vperm.slane %v149_v58, %v423_v4 }
  0x9c   :  { %v232_v19 = vsel %vm206_vm1, %v231_v1, %v230_v2 }
  0x9d   :  { %v234_v39 = vsel %vm210_vm2, %v233_v18, %v232_v19 }
  0x9e   :  { %v88_v43 = vpop.xlane.xlu2 %87  ;;  %v94_v44 = vpop.xlane.xlu1 %93 }
  0x9f   :  { %v91_v45 = vpop.xlane.xlu0 %90  ;;  %v152_v5 = vmul.f32 0.03125, %v88_v43  ;;  %v154_v7 = vmul.f32 0.03125, %v94_v44 }
  0xa0   :  { %v153_v9 = vmul.f32 0.03125, %v91_v45 }
  0xa1   :  { %v235_v23 = vperm.slane %v152_v5, %v429_v8  ;;  %v238_v24 = vperm.slane %v154_v7, %v426_v6 }
  0xa2   :  { %v237_v27 = vperm.slane %v153_v9, %v423_v4 }
  0xa3   :  { %v236_v43 = vsel %vm214_vm3, %v235_v23, %v234_v39 }
  0xa6   :  { %v106_v46 = vpop.xlane.xlu2 %105  ;;  %v103_v47 = vpop.xlane.xlu1 %102 }
  0xa7   :  { %v97_v48 = vpop.xlane.xlu0 %96  ;;  %v158_v11 = vmul.f32 0.03125, %v106_v46  ;;  %v157_v13 = vmul.f32 0.03125, %v103_v47  ;;  %v239_v46 = vsel %vm206_vm1, %v238_v24, %v237_v27 }
  0xa8   :  { %v155_v20 = vmul.f32 0.03125, %v97_v48 }
  0xa9   :  { %v245_v28 = vperm.slane %v158_v11, %v426_v6  ;;  %v244_v31 = vperm.slane %v157_v13, %v423_v4 }
  0xaa   :  { %v240_v35 = vperm.slane %v155_v20, %v432_v10 }
  0xab   :  { %v246_v47 = vsel %vm206_vm1, %v245_v28, %v244_v31 }
  0xae   :  { %v115_v49 = vpop.xlane.xlu2 %114  ;;  %v109_v50 = vpop.xlane.xlu1 %108 }
  0xaf   :  { %v100_v51 = vpop.xlane.xlu0 %99  ;;  %v161_v14 = vmul.f32 0.03125, %v115_v49  ;;  %v159_v25 = vmul.f32 0.03125, %v109_v50 }
  0xb0   :  { %v156_v26 = vmul.f32 0.03125, %v100_v51  ;;  %v241_v51 = vsel %vm210_vm2, %v240_v35, %v239_v46 }
  0xb1   :  { %v251_v32 = vperm.slane %v161_v14, %v423_v4  ;;  %v247_v40 = vperm.slane %v159_v25, %v432_v10 }
  0xb2   :  { %v242_v41 = vperm.slane %v156_v26, %v429_v8 }
  0xb3   :  { %v248_v57 = vsel %vm210_vm2, %v247_v40, %v246_v47 }
  0xb4   :  { %v243_v58 = vsel %vm214_vm3, %v242_v41, %v241_v51 }
  0xb6   :  { %v121_v54 = vpop.xlane.xlu2 %120  ;;  %v112_v55 = vpop.xlane.xlu1 %111 }
  0xb7   :  { %v118_v59 = vpop.xlane.xlu0 %117  ;;  %v163_v29 = vmul.f32 0.03125, %v121_v54  ;;  %v160_v30 = vmul.f32 0.03125, %v112_v55 }
  0xb8   :  { %v162_v15 = vmul.f32 0.03125, %v118_v59 }
  0xb9   :  { %v254_v44 = vperm.slane %v163_v29, %v432_v10  ;;  %v249_v45 = vperm.slane %v160_v30, %v429_v8 }
  0xba   :  { %v252_v33 = vperm.slane %v162_v15, %v426_v6 }
  0xbb   :  { %v250_v60 = vsel %vm214_vm3, %v249_v45, %v248_v57 }
  0xbc   :  { %v253_v48 = vsel %vm206_vm1, %v252_v33, %v251_v32 }
  0xbd   :  { %v255_v61 = vsel %vm210_vm2, %v254_v44, %v253_v48 }
  0xbe   :  { %v130_v16 = vpop.xlane.xlu1 %129  ;;  %v124_v21 = vpop.xlane.xlu2 %123 }
  0xbf   :  { %v127_v22 = vpop.xlane.xlu0 %126  ;;  %v164_v34 = vmul.f32 0.03125, %v124_v21  ;;  %v166_v37 = vmul.f32 0.03125, %v130_v16 }
  0xc0   :  { %v165_v38 = vmul.f32 0.03125, %v127_v22 }
  0xc1   :  { %v256_v49 = vperm.slane %v164_v34, %v429_v8  ;;  %v259_v52 = vperm.slane %v166_v37, %v426_v6  ;;  %v270_v6 = vsel %vm269_vm6, %v236_v43, %v268_v56 }
  0xc2   :  { %v258_v53 = vperm.slane %v165_v38, %v423_v4  ;;  %v272_v36 = vsel %vm271_vm7, %v243_v58, %v270_v6 }
  0xc3   :  { %v257_v4 = vsel %vm214_vm3, %v256_v49, %v255_v61  ;;  %v274_v1 = vsel %vm273_vm8, %v250_v60, %v272_v36 }
  0xc4   :  { %v260_v0 = vsel %vm206_vm1, %v259_v52, %v258_v53  ;;  %v276_v3 = vsel %vm275_vm9, %v257_v4, %v274_v1 }
  0xc6   :  { %v136_v50 = vpop.xlane.xlu1 %135 }
  0xc7   :  { %v133_v54 = vpop.xlane.xlu0 %132  ;;  %v168_v55 = vmul.f32 0.03125, %v136_v50 }
  0xc8   :  { %v167_v59 = vmul.f32 0.03125, %v133_v54 }
  0xc9   :  { %v263_v62 = vperm.slane %v168_v55, %v429_v8 }
  0xca   :  { %v261_v63 = vperm.slane %v167_v59, %v432_v10 }
  0xcc   :  { %v262_v2 = vsel %vm210_vm2, %v261_v63, %v260_v0 }
  0xcd   :  { %v264_v5 = vsel %vm214_vm3, %v263_v62, %v262_v2 }
  0xce   :  { %v278_v7 = vsel %vm277_vm10, %v264_v5, %v276_v3 }
  0xcf   :  { %280 = vst.msk [vmem:[%s501_s1] sm:$0xff] %vm40_vm0, %v278_v7 }

</bundles_post_ra>
